<compile_context>
chip_gen: v7x
topology: tpu7x:2x2x1
jax: 0.10.0
libtpu: 0.0.40
codegen_flags: <defaults>
</compile_context>

<pallas_src>
import functools

import jax
import jax.numpy as jnp
from jax.experimental import pallas as pl
from jax.experimental.pallas import tpu as pltpu

_NEG_BIG = -1e30  # finite "-inf" sentinel (avoids inf-inf NaN corner cases)


def _label_smoothing_kernel(tgt_ref, x_ref, loss_ref,
                            m_ref, l_ref, s_ref, t_ref, *,
                            eps, num_classes, ignore_index, tc, mask_classes):
    """Grid = (row_tiles, class_tiles); class axis is the (last) reduction axis.

    tgt_ref : (TB, 1)  int32   target per row (same block for every class tile)
    x_ref   : (TB, TC) logits  (upcast to f32 inside)
    loss_ref: (TB, 1)  f32     per-row loss (written on last class tile)
    m/l/s/t : (TB, 1)  f32     running max / running sum-exp / sum logits / target logit
    """
    k = pl.program_id(1)

    @pl.when(k == 0)
    def _init():
        m_ref[...] = jnp.full_like(m_ref, _NEG_BIG)
        l_ref[...] = jnp.zeros_like(l_ref)
        s_ref[...] = jnp.zeros_like(s_ref)
        t_ref[...] = jnp.zeros_like(t_ref)

    x = x_ref[...].astype(jnp.float32)                      # (TB, TC)
    tgt = tgt_ref[...]                                      # (TB, 1) int32
    col = jax.lax.broadcasted_iota(jnp.int32, x.shape, 1) + k * tc  # global class id

    if mask_classes:  # only emitted when the class dim was padded
        valid = col < num_classes
        x_max_in = jnp.where(valid, x, _NEG_BIG)
        x_sum_in = jnp.where(valid, x, 0.0)
    else:
        x_max_in = x
        x_sum_in = x

    # Gather the target logit: the target column falls in exactly one class tile.
    tgt_c = jnp.where(tgt == ignore_index, 0, tgt)
    t_ref[...] += jnp.sum(jnp.where(col == tgt_c, x, 0.0), axis=-1, keepdims=True)

    # Sum of logits (for the uniform-smoothing term: sum log_p = sum logits - C*LSE).
    s_ref[...] += jnp.sum(x_sum_in, axis=-1, keepdims=True)

    # Online logsumexp update.
    m_prev = m_ref[...]
    m_new = jnp.maximum(m_prev, jnp.max(x_max_in, axis=-1, keepdims=True))
    alpha = jnp.exp(m_prev - m_new)
    l_ref[...] = alpha * l_ref[...] + jnp.sum(jnp.exp(x_max_in - m_new),
                                              axis=-1, keepdims=True)
    m_ref[...] = m_new

    @pl.when(k == pl.num_programs(1) - 1)
    def _finalize():
        lse = m_ref[...] + jnp.log(l_ref[...])              # (TB, 1)
        log_p_tgt = t_ref[...] - lse
        sum_log_p = s_ref[...] - num_classes * lse
        w_tgt = 1.0 - eps - eps / num_classes
        w_uni = eps / num_classes
        non_pad = (tgt != ignore_index).astype(jnp.float32)
        loss_ref[...] = -(w_tgt * log_p_tgt + w_uni * sum_log_p) * non_pad


def _round_up(x, m):
    return (x + m - 1) // m * m


def label_smoothing_loss(output, target, *, label_smoothing, tgt_vocab_size,
                         ignore_index=-100, row_tile=None, class_tile=None):
    """output: (B, C) float (f32 or bf16); target: (B,) int. Returns (B,) f32 loss."""
    B, C = output.shape
    assert C == tgt_vocab_size
    itemsize = jnp.dtype(output.dtype).itemsize

    # ---- tile sizes (fit comfortably in VMEM on v5e/v6e/v7x) -----------------
    if class_tile is None:
        class_tile = min(_round_up(C, 128), 2048)
    if row_tile is None:
        budget = 8 * 1024 * 1024  # per-buffer budget for one logits tile
        tb_cap = max(8, (budget // (class_tile * itemsize)) // 8 * 8)
        row_tile = int(min(_round_up(B, 8), tb_cap, 1024))
    TB, TC = int(row_tile), int(class_tile)

    Bp = _round_up(B, TB)
    Cp = _round_up(C, TC)

    x = output
    if (Bp, Cp) != (B, C):
        x = jnp.pad(x, ((0, Bp - B), (0, Cp - C)))
    # Padded rows get ignore_index -> their loss is masked to 0 and sliced off.
    tgt2d = jnp.full((Bp, 1), ignore_index, dtype=jnp.int32)
    tgt2d = tgt2d.at[:B, 0].set(target.astype(jnp.int32))

    kernel = functools.partial(
        _label_smoothing_kernel,
        eps=float(label_smoothing),
        num_classes=int(tgt_vocab_size),
        ignore_index=int(ignore_index),
        tc=TC,
        mask_classes=(Cp != C),
    )

    grid = (Bp // TB, Cp // TC)

    # Raise the scoped VMEM limit explicitly (defaults: 16 MiB v5e / 32 MiB
    # v6e+v7x); stay under v7x's 64 MiB physical VMEM.
    est = 2 * TB * TC * itemsize + 4 * TB * 128 * 4 + 4 * TB * 4
    vmem_limit = int(min(56 * 1024 * 1024, max(3 * est, 16 * 1024 * 1024)))

    loss = pl.pallas_call(
        kernel,
        out_shape=jax.ShapeDtypeStruct((Bp, 1), jnp.float32),
        grid_spec=pltpu.PrefetchScalarGridSpec(
            num_scalar_prefetch=0,
            grid=grid,
            in_specs=[
                pl.BlockSpec((TB, 1), lambda i, k: (i, 0)),   # targets
                pl.BlockSpec((TB, TC), lambda i, k: (i, k)),  # logits
            ],
            out_specs=pl.BlockSpec((TB, 1), lambda i, k: (i, 0)),
            scratch_shapes=[pltpu.VMEM((TB, 1), jnp.float32)] * 4,
        ),
        compiler_params=pltpu.CompilerParams(
            dimension_semantics=("parallel", "arbitrary"),
            vmem_limit_bytes=vmem_limit,
        ),
    )(tgt2d, x)
    return loss[:B, 0]


def _reference(output, target, eps, num_classes, ignore_index=-100):
    non_pad = (target != ignore_index).astype(jnp.float32)
    tgt = jnp.where(target == ignore_index, 0, target)
    one_hot = jax.nn.one_hot(tgt, num_classes, dtype=jnp.float32)
    one_hot = one_hot * (1 - eps) + (1 - one_hot) * eps / num_classes
    log_prb = jax.nn.log_softmax(output.astype(jnp.float32), axis=-1)
    loss = -(one_hot * log_prb).sum(axis=-1)
    return loss * non_pad


if __name__ == "__main__":
    EPS = 0.1
    IGNORE = -100
    key = jax.random.PRNGKey(0)

    # Case 1: small ragged shapes (exercises row + class padding/masking).
    B, V = 10, 200
    k1, k2, key = jax.random.split(key, 3)
    logits = jax.random.normal(k1, (B, V), dtype=jnp.float32)
    target = jax.random.randint(k2, (B,), 0, V, dtype=jnp.int32)
    target = target.at[3].set(IGNORE)  # exercise ignore_index masking
    loss = jax.block_until_ready(label_smoothing_loss(
        logits, target, label_smoothing=EPS, tgt_vocab_size=V,
        ignore_index=IGNORE))
    ref = _reference(logits, target, EPS, V, IGNORE)
    assert loss.shape == (B,)
    assert jnp.allclose(loss, ref, atol=1e-4, rtol=1e-4), (loss, ref)

    # Case 2: force small tiles -> multi-tile grid (3 row tiles x 3 class tiles)
    # to exercise the online-LSE accumulation and the parallel row axis.
    B, V = 24, 384
    k1, k2, key = jax.random.split(key, 3)
    logits = 3.0 * jax.random.normal(k1, (B, V), dtype=jnp.float32)
    target = jax.random.randint(k2, (B,), 0, V, dtype=jnp.int32)
    target = target.at[0].set(IGNORE)
    loss = jax.block_until_ready(label_smoothing_loss(
        logits, target, label_smoothing=EPS, tgt_vocab_size=V,
        ignore_index=IGNORE, row_tile=8, class_tile=128))
    ref = _reference(logits, target, EPS, V, IGNORE)
    assert jnp.allclose(loss, ref, atol=1e-4, rtol=1e-4), (loss, ref)

    print("KERNEL_OK")
</pallas_src>

<mosaic_0001>
module attributes {stable_mosaic.version = 11 : i64} {
  func.func @_label_smoothing_kernel(%arg0: i32, %arg1: i32, %arg2: memref<16x1xi32, #tpu.memory_space<vmem>>, %arg3: memref<16x256xf32, #tpu.memory_space<vmem>>, %arg4: memref<16x1xf32, #tpu.memory_space<vmem>>, %arg5: memref<16x1xf32, #tpu.memory_space<vmem>>, %arg6: memref<16x1xf32, #tpu.memory_space<vmem>>, %arg7: memref<16x1xf32, #tpu.memory_space<vmem>>, %arg8: memref<16x1xf32, #tpu.memory_space<vmem>>) attributes {dimension_semantics = [#tpu.dimension_semantics<parallel>, #tpu.dimension_semantics<arbitrary>], iteration_bounds = array<i64: 1, 1>, scalar_prefetch = 0 : i64, scratch_operands = 4 : i64, tpu.core_type = #tpu.core_type<tc>, window_params = [{transform_indices = @transform_0, window_bounds = array<i64: 16, 1>}, {transform_indices = @transform_1, window_bounds = array<i64: 16, 256>}, {transform_indices = @transform_2, window_bounds = array<i64: 16, 1>}]} {
    %c0_i32 = arith.constant 0 : i32
    %0 = arith.cmpi eq, %arg1, %c0_i32 : i32
    %1 = arith.extui %0 : i1 to i32
    %c0_i32_0 = arith.constant 0 : i32
    %2 = arith.cmpi ne, %1, %c0_i32_0 : i32
    scf.if %2 {
      %cst_29 = arith.constant -1.000000e+30 : f32
      %52 = vector.broadcast %cst_29 : f32 to vector<16x1xf32>
      %c0_30 = arith.constant 0 : index
      %c0_31 = arith.constant 0 : index
      %53 = vector.load %arg5[%c0_30, %c0_31] : memref<16x1xf32, #tpu.memory_space<vmem>>, vector<16x1xf32>
      tpu.vector_store %arg5[%c0_30, %c0_31], %52 {strides = array<i32>} : memref<16x1xf32, #tpu.memory_space<vmem>>, vector<16x1xf32>,
      %cst_32 = arith.constant 0.000000e+00 : f32
      %54 = vector.broadcast %cst_32 : f32 to vector<16x1xf32>
      %c0_33 = arith.constant 0 : index
      %c0_34 = arith.constant 0 : index
      %55 = vector.load %arg6[%c0_33, %c0_34] : memref<16x1xf32, #tpu.memory_space<vmem>>, vector<16x1xf32>
      tpu.vector_store %arg6[%c0_33, %c0_34], %54 {strides = array<i32>} : memref<16x1xf32, #tpu.memory_space<vmem>>, vector<16x1xf32>,
      %cst_35 = arith.constant 0.000000e+00 : f32
      %56 = vector.broadcast %cst_35 : f32 to vector<16x1xf32>
      %c0_36 = arith.constant 0 : index
      %c0_37 = arith.constant 0 : index
      %57 = vector.load %arg7[%c0_36, %c0_37] : memref<16x1xf32, #tpu.memory_space<vmem>>, vector<16x1xf32>
      tpu.vector_store %arg7[%c0_36, %c0_37], %56 {strides = array<i32>} : memref<16x1xf32, #tpu.memory_space<vmem>>, vector<16x1xf32>,
      %cst_38 = arith.constant 0.000000e+00 : f32
      %58 = vector.broadcast %cst_38 : f32 to vector<16x1xf32>
      %c0_39 = arith.constant 0 : index
      %c0_40 = arith.constant 0 : index
      %59 = vector.load %arg8[%c0_39, %c0_40] : memref<16x1xf32, #tpu.memory_space<vmem>>, vector<16x1xf32>
      tpu.vector_store %arg8[%c0_39, %c0_40], %58 {strides = array<i32>} : memref<16x1xf32, #tpu.memory_space<vmem>>, vector<16x1xf32>,
    } else {
    }
    %c0 = arith.constant 0 : index
    %c0_1 = arith.constant 0 : index
    %3 = vector.load %arg3[%c0, %c0_1] : memref<16x256xf32, #tpu.memory_space<vmem>>, vector<16x256xf32>
    %c0_2 = arith.constant 0 : index
    %c0_3 = arith.constant 0 : index
    %4 = vector.load %arg2[%c0_2, %c0_3] : memref<16x1xi32, #tpu.memory_space<vmem>>, vector<16x1xi32>
    %5 = tpu.iota {dimensions = array<i32: 1>} : vector<16x256xi32>
    %c256_i32 = arith.constant 256 : i32
    %6 = arith.muli %arg1, %c256_i32 : i32
    %7 = vector.broadcast %6 : i32 to vector<16x256xi32>
    %8 = arith.addi %5, %7 : vector<16x256xi32>
    %c200_i32 = arith.constant 200 : i32
    %9 = vector.broadcast %c200_i32 : i32 to vector<16x256xi32>
    %10 = arith.cmpi slt, %8, %9 : vector<16x256xi32>
    %cst = arith.constant -1.000000e+30 : f32
    %11 = vector.broadcast %cst : f32 to vector<16x256xf32>
    %12 = arith.select %10, %3, %11 : vector<16x256xi1>, vector<16x256xf32>
    %cst_4 = arith.constant 0.000000e+00 : f32
    %13 = vector.broadcast %cst_4 : f32 to vector<16x256xf32>
    %14 = arith.select %10, %3, %13 : vector<16x256xi1>, vector<16x256xf32>
    %c-100_i32 = arith.constant -100 : i32
    %15 = vector.broadcast %c-100_i32 : i32 to vector<16x1xi32>
    %16 = arith.cmpi eq, %4, %15 : vector<16x1xi32>
    %c0_i32_5 = arith.constant 0 : i32
    %17 = vector.broadcast %c0_i32_5 : i32 to vector<16x1xi32>
    %18 = arith.select %16, %17, %4 : vector<16x1xi1>, vector<16x1xi32>
    %c0_6 = arith.constant 0 : index
    %c0_7 = arith.constant 0 : index
    %19 = vector.load %arg8[%c0_6, %c0_7] : memref<16x1xf32, #tpu.memory_space<vmem>>, vector<16x1xf32>
    %20 = vector.broadcast %18 : vector<16x1xi32> to vector<16x256xi32>
    %21 = arith.cmpi eq, %8, %20 : vector<16x256xi32>
    %cst_8 = arith.constant 0.000000e+00 : f32
    %22 = vector.broadcast %cst_8 : f32 to vector<16x256xf32>
    %23 = arith.select %21, %3, %22 : vector<16x256xi1>, vector<16x256xf32>
    %cst_9 = arith.constant dense<0.000000e+00> : vector<16xf32>
    %24 = vector.multi_reduction <add>, %23, %cst_9 [1] : vector<16x256xf32> to vector<16xf32>
    %25 = vector.shape_cast %24 : vector<16xf32> to vector<16x1xf32>
    %26 = arith.addf %19, %25 : vector<16x1xf32>
    %c0_10 = arith.constant 0 : index
    %c0_11 = arith.constant 0 : index
    %27 = vector.load %arg8[%c0_10, %c0_11] : memref<16x1xf32, #tpu.memory_space<vmem>>, vector<16x1xf32>
    tpu.vector_store %arg8[%c0_10, %c0_11], %26 {strides = array<i32>} : memref<16x1xf32, #tpu.memory_space<vmem>>, vector<16x1xf32>,
    %c0_12 = arith.constant 0 : index
    %c0_13 = arith.constant 0 : index
    %28 = vector.load %arg7[%c0_12, %c0_13] : memref<16x1xf32, #tpu.memory_space<vmem>>, vector<16x1xf32>
    %cst_14 = arith.constant dense<0.000000e+00> : vector<16xf32>
    %29 = vector.multi_reduction <add>, %14, %cst_14 [1] : vector<16x256xf32> to vector<16xf32>
    %30 = vector.shape_cast %29 : vector<16xf32> to vector<16x1xf32>
    %31 = arith.addf %28, %30 : vector<16x1xf32>
    %c0_15 = arith.constant 0 : index
    %c0_16 = arith.constant 0 : index
    %32 = vector.load %arg7[%c0_15, %c0_16] : memref<16x1xf32, #tpu.memory_space<vmem>>, vector<16x1xf32>
    tpu.vector_store %arg7[%c0_15, %c0_16], %31 {strides = array<i32>} : memref<16x1xf32, #tpu.memory_space<vmem>>, vector<16x1xf32>,
    %c0_17 = arith.constant 0 : index
    %c0_18 = arith.constant 0 : index
    %33 = vector.load %arg5[%c0_17, %c0_18] : memref<16x1xf32, #tpu.memory_space<vmem>>, vector<16x1xf32>
    %cst_19 = arith.constant dense<0xFF800000> : vector<16xf32>
    %34 = vector.multi_reduction <maximumf>, %12, %cst_19 [1] : vector<16x256xf32> to vector<16xf32>
    %35 = vector.shape_cast %34 : vector<16xf32> to vector<16x1xf32>
    %36 = arith.maximumf %33, %35 : vector<16x1xf32>
    %37 = arith.subf %33, %36 : vector<16x1xf32>
    %38 = math.exp %37 : vector<16x1xf32>
    %c0_20 = arith.constant 0 : index
    %c0_21 = arith.constant 0 : index
    %39 = vector.load %arg6[%c0_20, %c0_21] : memref<16x1xf32, #tpu.memory_space<vmem>>, vector<16x1xf32>
    %40 = arith.mulf %38, %39 : vector<16x1xf32>
    %41 = vector.broadcast %36 : vector<16x1xf32> to vector<16x256xf32>
    %42 = arith.subf %12, %41 : vector<16x256xf32>
    %43 = math.exp %42 : vector<16x256xf32>
    %cst_22 = arith.constant dense<0.000000e+00> : vector<16xf32>
    %44 = vector.multi_reduction <add>, %43, %cst_22 [1] : vector<16x256xf32> to vector<16xf32>
    %45 = vector.shape_cast %44 : vector<16xf32> to vector<16x1xf32>
    %46 = arith.addf %40, %45 : vector<16x1xf32>
    %c0_23 = arith.constant 0 : index
    %c0_24 = arith.constant 0 : index
    %47 = vector.load %arg6[%c0_23, %c0_24] : memref<16x1xf32, #tpu.memory_space<vmem>>, vector<16x1xf32>
    tpu.vector_store %arg6[%c0_23, %c0_24], %46 {strides = array<i32>} : memref<16x1xf32, #tpu.memory_space<vmem>>, vector<16x1xf32>,
    %c0_25 = arith.constant 0 : index
    %c0_26 = arith.constant 0 : index
    %48 = vector.load %arg5[%c0_25, %c0_26] : memref<16x1xf32, #tpu.memory_space<vmem>>, vector<16x1xf32>
    tpu.vector_store %arg5[%c0_25, %c0_26], %36 {strides = array<i32>} : memref<16x1xf32, #tpu.memory_space<vmem>>, vector<16x1xf32>,
    %c0_i32_27 = arith.constant 0 : i32
    %49 = arith.cmpi eq, %arg1, %c0_i32_27 : i32
    %50 = arith.extui %49 : i1 to i32
    %c0_i32_28 = arith.constant 0 : i32
    %51 = arith.cmpi ne, %50, %c0_i32_28 : i32
    scf.if %51 {
      %c0_29 = arith.constant 0 : index
      %c0_30 = arith.constant 0 : index
      %52 = vector.load %arg5[%c0_29, %c0_30] : memref<16x1xf32, #tpu.memory_space<vmem>>, vector<16x1xf32>
      %c0_31 = arith.constant 0 : index
      %c0_32 = arith.constant 0 : index
      %53 = vector.load %arg6[%c0_31, %c0_32] : memref<16x1xf32, #tpu.memory_space<vmem>>, vector<16x1xf32>
      %54 = math.log %53 : vector<16x1xf32>
      %55 = arith.addf %52, %54 : vector<16x1xf32>
      %c0_33 = arith.constant 0 : index
      %c0_34 = arith.constant 0 : index
      %56 = vector.load %arg8[%c0_33, %c0_34] : memref<16x1xf32, #tpu.memory_space<vmem>>, vector<16x1xf32>
      %57 = arith.subf %56, %55 : vector<16x1xf32>
      %c0_35 = arith.constant 0 : index
      %c0_36 = arith.constant 0 : index
      %58 = vector.load %arg7[%c0_35, %c0_36] : memref<16x1xf32, #tpu.memory_space<vmem>>, vector<16x1xf32>
      %cst_37 = arith.constant 2.000000e+02 : f32
      %59 = vector.broadcast %cst_37 : f32 to vector<16x1xf32>
      %60 = arith.mulf %59, %55 : vector<16x1xf32>
      %61 = arith.subf %58, %60 : vector<16x1xf32>
      %c-100_i32_38 = arith.constant -100 : i32
      %62 = vector.broadcast %c-100_i32_38 : i32 to vector<16x1xi32>
      %63 = arith.cmpi ne, %4, %62 : vector<16x1xi32>
      %64 = arith.extui %63 : vector<16x1xi1> to vector<16x1xi32>
      %65 = arith.sitofp %64 : vector<16x1xi32> to vector<16x1xf32>
      %cst_39 = arith.constant 8.995000e-01 : f32
      %66 = vector.broadcast %cst_39 : f32 to vector<16x1xf32>
      %67 = arith.mulf %66, %57 : vector<16x1xf32>
      %cst_40 = arith.constant 5.000000e-04 : f32
      %68 = vector.broadcast %cst_40 : f32 to vector<16x1xf32>
      %69 = arith.mulf %68, %61 : vector<16x1xf32>
      %70 = arith.addf %67, %69 : vector<16x1xf32>
      %cst_41 = arith.constant 0.000000e+00 : f32
      %71 = vector.broadcast %cst_41 : f32 to vector<16x1xf32>
      %72 = arith.subf %71, %70 : vector<16x1xf32>
      %73 = arith.mulf %72, %65 : vector<16x1xf32>
      %c0_42 = arith.constant 0 : index
      %c0_43 = arith.constant 0 : index
      %74 = vector.load %arg4[%c0_42, %c0_43] : memref<16x1xf32, #tpu.memory_space<vmem>>, vector<16x1xf32>
      tpu.vector_store %arg4[%c0_42, %c0_43], %73 {strides = array<i32>} : memref<16x1xf32, #tpu.memory_space<vmem>>, vector<16x1xf32>,
    } else {
    }
    return
  }
  func.func @transform_0(%arg0: i32, %arg1: i32) -> (i32, i32) {
    %c0_i32 = arith.constant 0 : i32
    %c0_i32_0 = arith.constant 0 : i32
    return %arg0, %c0_i32 : i32, i32
  }
  func.func @transform_1(%arg0: i32, %arg1: i32) -> (i32, i32) {
    %c0_i32 = arith.constant 0 : i32
    return %arg0, %arg1 : i32, i32
  }
  func.func @transform_2(%arg0: i32, %arg1: i32) -> (i32, i32) {
    %c0_i32 = arith.constant 0 : i32
    %c0_i32_0 = arith.constant 0 : i32
    return %arg0, %c0_i32 : i32, i32
  }
}

</mosaic_0001>

<bundles_post_ra>
// kernel: tpu_custom_call.1
= control target key start
LH: loop header
LB: loop body
LE: loop exit
PB: predicated region body
PF: predicated region fallthrough
CT: control target
= control target key end

     0   :  { %7 = vsyncpa [#allocation7], 0  ;;  %s254_s9 = smov [#allocation6]   ;;  %s363_s0 = inlined_call_operand.vmem [shape: s32[16,1], index: 0, kind: input, shape index: {}]   ;;  %s364_s1 = inlined_call_operand.hbm [shape: f32[16,256], index: 1, kind: input, shape index: {}]   ;;  %s365_s2 = inlined_call_operand.vmem [shape: f32[16,1], index: 2, kind: output, shape index: {}]  }
   0x1   :  { %s15_s10 = sshll.u32 %s254_s9, 4  ;;  %s230_s13 = scalar_lea.hbm %s364_s1, 512  ;;  %s16_s10 = int_to_ptr.vmem [resolvable:$true] %s15_s10 }
   0x2   :  { %p231_p0 = scmp.ne.s32.totalorder %s364_s1, %s230_s13  ;;  %p234_p1 = scmp.lt.u32.totalorder %s230_s13, %s364_s1 }
   0x4   :  { %p236_p2 = pnand %p234_p1, %p231_p0 }
   0x6   :  { %239 = shalt.err (!%p236_p2)
}
   0x7   :  { %s240_s18 = scalar_lea.vmem %s16_s10, 512  ;;  %p245_p4 = scmp.lt.s32.totalorder %s16_s10, %s16_s10 }
   0x8   :  { %p241_p3 = scmp.ne.s32.totalorder %s16_s10, %s240_s18  ;;  %p246_p5 = scmp.lt.s32.totalorder %s240_s18, %s240_s18 }
   0xa   :  { %p247_p6 = por %p246_p5, %p245_p4 }
   0xc   :  { %p248_p7 = pnand %p247_p6, %p241_p3 }
   0xe   :  { %251 = shalt.err (!%p248_p7)
}
   0xf   :  { %s255_s19 = smov 256   ;;  %s256_s20 = smov 16  }
  0x10   :  { %21 = dma.hbm_to_vmem [thread:$0]  %s364_s1, 512, %s16_s10, [#allocation7], %s255_s19, %s255_s19, %s256_s20  }
  0x11   :  { %252 = dma.done.wait [#allocation7], 512  }
  0x12   :  { %253 = vsyncadd [#allocation7], 4294966784  ;;  %v44_v0 = vlaneseq  ;;  %vm29_vm0 = vcmask 7168   ;;  %v257_v1 = vmov -1e+30   ;;  %v295_v4 = vld [vmem:[#allocation6] sm:$0xff] }
  0x13   :  { %30 = vst.msk [vmem:[#allocation2] sm:$0xff] %vm29_vm0, %v257_v1  ;;  %31 = vst.msk [vmem:[#allocation2 + $0x8] sm:$0xff] %vm29_vm0, %v257_v1  ;;  %v297_v5 = vld [vmem:[#allocation6 + $0x8] sm:$0xff]  ;;  %v302_v7 = vld [vmem:[#allocation6 + $0x10] sm:$0xff]  ;;  %v258_v12 = vmov 0   ;;  %v259_v13 = vmov 0.0  }
  0x14   :  { %v289_v2 = vand.u32 127, %v44_v0  ;;  %v304_v8 = vld [vmem:[#allocation6 + $0x18] sm:$0xff]  ;;  %212 = vset.pattern.permute.xlu1 %v258_v12  ;;  %213 = vset.pattern.permute.xlu0 %v258_v12  ;;  %32 = vst.msk [vmem:[#allocation3] sm:$0xff] %vm29_vm0, %v259_v13  ;;  %33 = vst.msk [vmem:[#allocation3 + $0x8] sm:$0xff] %vm29_vm0, %v259_v13  ;;  %v43_v14 = vld [vmem:[%s363_s0 + $0x8] sm:$0xff] }
  0x15   :  { %34 = vst.msk [vmem:[#allocation4] sm:$0xff] %vm29_vm0, %v259_v13  ;;  %35 = vst.msk [vmem:[#allocation4 + $0x8] sm:$0xff] %vm29_vm0, %v259_v13  ;;  %vm182_vm2 = vcmp.ne.s32.totalorder %v43_v14, 4294967196  ;;  %v42_v15 = vld [vmem:[%s363_s0] sm:$0xff]  ;;  %vm62_vm5 = vcmp.eq.s32.totalorder %v43_v14, 4294967196 }
  0x16   :  { %v292_v3 = vadd.s32 128, %v289_v2  ;;  %36 = vst.msk [vmem:[#allocation5] sm:$0xff] %vm29_vm0, %v259_v13  ;;  %37 = vst.msk [vmem:[#allocation5 + $0x8] sm:$0xff] %vm29_vm0, %v259_v13  ;;  %v323_v16 = vsel %vm182_vm2, 1.0, %v259_v13  ;;  %vm61_vm3 = vcmp.eq.s32.totalorder %v42_v15, 4294967196  ;;  %vm181_vm4 = vcmp.ne.s32.totalorder %v42_v15, 4294967196 }
  0x17   :  { %v63_v17 = vsel %vm61_vm3, 0, %v42_v15  ;;  %v325_v18 = vsel %vm181_vm4, 1.0, %v259_v13  ;;  %v64_v27 = vsel %vm62_vm5, 0, %v43_v14 }
  0x18   :  { %vm52_vm1 = vcmp.lt.s32.totalorder %v292_v3, 200 }
  0x19   :  { %v54_v6 = vsel %vm52_vm1, %v297_v5, -1e+30  ;;  %v56_v10 = vsel %vm52_vm1, %v304_v8, -1e+30  ;;  %v58_v51 = vsel %vm52_vm1, %v297_v5, 0.0  ;;  %v60_v54 = vsel %vm52_vm1, %v304_v8, 0.0 }
  0x1a   :  { %v106_v9 = vmax.f32 %v295_v4, %v54_v6  ;;  %v109_v11 = vmax.f32 %v302_v7, %v56_v10  ;;  %v104_v19 = vld [vmem:[#allocation2] sm:$0xff]  ;;  %v105_v22 = vld [vmem:[#allocation2 + $0x8] sm:$0xff]  ;;  %v94_v53 = vadd.f32 %v58_v51, %v295_v4  ;;  %v97_v55 = vadd.f32 %v60_v54, %v302_v7 }
  0x1b   :  { %v120_v62 = vld [vmem:[#allocation3] sm:$0xff] }
  0x1c   :  { %107 = vmax.xlane.f32.xlu0 %v106_v9  ;;  %v93_v15 = vld [vmem:[#allocation4 + $0x8] sm:$0xff] }
  0x1d   :  { %v65_v57 = vld [vmem:[#allocation5] sm:$0xff] }
  0x20   :  { %110 = vmax.xlane.f32.xlu0 %v109_v11  ;;  %v92_v11 = vld [vmem:[#allocation4] sm:$0xff] }
  0x36   :  { %68 = vperm.xlu0 %213, %v63_v17  }
  0xa9   :  { %v108_v20 = vpop.xlane.xlu0 %107 }
  0xaa   :  { %v112_v21 = vmax.f32 %v104_v19, %v108_v20 }
  0xac   :  { %v114_v23 = vsub.f32 %v104_v19, %v112_v21  ;;  %156 = vst.msk [vmem:[#allocation2] sm:$0xff] %vm29_vm0, %v112_v21  ;;  %126 = vperm.xlu1 %212, %v112_v21  }
  0xad   :  { %v111_v24 = vpop.xlane.xlu0 %110 }
  0xae   :  { %v113_v25 = vmax.f32 %v105_v22, %v111_v24  ;;  %v116_v59 = vmul.f32 1.442695, %v114_v23 }
  0xb0   :  { %v115_v26 = vsub.f32 %v105_v22, %v113_v25  ;;  %157 = vst.msk [vmem:[#allocation2 + $0x8] sm:$0xff] %vm29_vm0, %v113_v25  ;;  %131 = vperm.xlu1 %212, %v113_v25  }
  0xb2   :  { %v118_v60 = vmul.f32 1.442695, %v115_v26 }
  0xb3   :  { %v161_v22 = vld [vmem:[#allocation2] sm:$0xff] }
  0xb4   :  { %71 = vperm.xlu1 %212, %v64_v27  }
  0xb5   :  { %v69_v28 = vpop.permute.xlu0 %68 }
  0xb6   :  { %vm73_vm6 = vcmp.eq.s32.totalorder %v289_v2, %v69_v28  ;;  %vm74_vm7 = vcmp.eq.s32.totalorder %v292_v3, %v69_v28 }
  0xb7   :  { %v77_v29 = vsel %vm73_vm6, %v295_v4, 0.0  ;;  %v78_v30 = vsel %vm74_vm7, %v297_v5, 0.0 }
  0xb8   :  { %v81_v31 = vadd.f32 %v78_v30, %v77_v29  ;;  %v162_v30 = vld [vmem:[#allocation2 + $0x8] sm:$0xff] }
  0xba   :  { %82 = vadd.xlane.f32.xlu0 %v81_v31 }
 0x12b   :  { %v127_v32 = vpop.permute.xlu1 %126 }
 0x12c   :  { %v134_v33 = vsub.f32 %v295_v4, %v127_v32  ;;  %v135_v34 = vsub.f32 %v54_v6, %v127_v32 }
 0x12e   :  { %v138_v35 = vmul.f32 1.442695, %v134_v33  ;;  %v140_v36 = vmul.f32 1.442695, %v135_v34 }
 0x12f   :  { %v132_v37 = vpop.permute.xlu1 %131 }
 0x130   :  { %214 = vpow2.f32 %v138_v35  ;;  %v136_v38 = vsub.f32 %v302_v7, %v132_v37  ;;  %v137_v39 = vsub.f32 %v56_v10, %v132_v37 }
 0x131   :  { %216 = vpow2.f32 %v140_v36 }
 0x132   :  { %v142_v40 = vmul.f32 1.442695, %v136_v38  ;;  %v144_v41 = vmul.f32 1.442695, %v137_v39 }
 0x133   :  { %v72_v44 = vpop.permute.xlu1 %71 }
 0x134   :  { %218 = vpow2.f32 %v142_v40  ;;  %vm75_vm8 = vcmp.eq.s32.totalorder %v289_v2, %v72_v44  ;;  %vm76_vm9 = vcmp.eq.s32.totalorder %v292_v3, %v72_v44  ;;  %v121_v2 = vld [vmem:[#allocation3 + $0x8] sm:$0xff] }
 0x135   :  { %220 = vpow2.f32 %v144_v41  ;;  %v79_v49 = vsel %vm75_vm8, %v302_v7, 0.0  ;;  %v80_v50 = vsel %vm76_vm9, %v304_v8, 0.0  ;;  %v66_v7 = vld [vmem:[#allocation5 + $0x8] sm:$0xff] }
 0x136   :  { %v84_v52 = vadd.f32 %v80_v50, %v79_v49  ;;  %222 = vpow2.f32 %v116_v59 }
 0x137   :  { %224 = vpow2.f32 %v118_v60 }
 0x13a   :  { %v215_v42 = vpop.eup %214 }
 0x13b   :  { %v217_v43 = vpop.eup %216 }
 0x13c   :  { %v146_v45 = vadd.f32 %v217_v43, %v215_v42 }
 0x13e   :  { %v219_v46 = vpop.eup %218  ;;  %147 = vadd.xlane.f32.xlu1 %v146_v45 }
 0x13f   :  { %v221_v47 = vpop.eup %220 }
 0x140   :  { %v149_v48 = vadd.f32 %v221_v47, %v219_v46  ;;  %v223_v61 = vpop.eup %222 }
 0x141   :  { %v122_v63 = vmul.f32 %v223_v61, %v120_v62  ;;  %v225_v0 = vpop.eup %224 }
 0x142   :  { %150 = vadd.xlane.f32.xlu1 %v149_v48  ;;  %v123_v4 = vmul.f32 %v225_v0, %v121_v2 }
 0x146   :  { %85 = vadd.xlane.f32.xlu1 %v84_v52 }
 0x147   :  { %v83_v56 = vpop.xlane.xlu0 %82 }
 0x148   :  { %v87_v58 = vadd.f32 %v83_v56, %v65_v57 }
 0x14a   :  { %95 = vadd.xlane.f32.xlu1 %v94_v53  ;;  %90 = vst.msk [vmem:[#allocation5] sm:$0xff] %vm29_vm0, %v87_v58 }
 0x14e   :  { %98 = vadd.xlane.f32.xlu1 %v97_v55 }
 0x151   :  { %v171_v23 = vld [vmem:[#allocation5] sm:$0xff] }
 0x1cb   :  { %v148_v1 = vpop.xlane.xlu1 %147 }
 0x1cc   :  { %v152_v3 = vadd.f32 %v148_v1, %v122_v63 }
 0x1ce   :  { %154 = vst.msk [vmem:[#allocation3] sm:$0xff] %vm29_vm0, %v152_v3 }
 0x1cf   :  { %v151_v5 = vpop.xlane.xlu1 %150 }
 0x1d0   :  { %v153_v6 = vadd.f32 %v151_v5, %v123_v4 }
 0x1d2   :  { %155 = vst.msk [vmem:[#allocation3 + $0x8] sm:$0xff] %vm29_vm0, %v153_v6 }
 0x1d3   :  { %v86_v8 = vpop.xlane.xlu1 %85 }
 0x1d4   :  { %v88_v9 = vadd.f32 %v86_v8, %v66_v7 }
 0x1d5   :  { %v163_v10 = vld [vmem:[#allocation3] sm:$0xff] }
 0x1d6   :  { %226 = vlog2.f32 %v163_v10  ;;  %91 = vst.msk [vmem:[#allocation5 + $0x8] sm:$0xff] %vm29_vm0, %v88_v9 }
 0x1d7   :  { %v96_v12 = vpop.xlane.xlu1 %95 }
 0x1d8   :  { %v100_v13 = vadd.f32 %v96_v12, %v92_v11 }
 0x1d9   :  { %v164_v14 = vld [vmem:[#allocation3 + $0x8] sm:$0xff] }
 0x1da   :  { %228 = vlog2.f32 %v164_v14  ;;  %102 = vst.msk [vmem:[#allocation4] sm:$0xff] %vm29_vm0, %v100_v13 }
 0x1db   :  { %v99_v17 = vpop.xlane.xlu1 %98 }
 0x1dc   :  { %v101_v19 = vadd.f32 %v99_v17, %v93_v15 }
 0x1dd   :  { %v172_v33 = vld [vmem:[#allocation5 + $0x8] sm:$0xff] }
 0x1de   :  { %103 = vst.msk [vmem:[#allocation4 + $0x8] sm:$0xff] %vm29_vm0, %v101_v19 }
 0x1e0   :  { %v227_v20 = vpop.eup %226 }
 0x1e1   :  { %v166_v21 = vmul.f32 0.6931472, %v227_v20  ;;  %v175_v26 = vld [vmem:[#allocation4] sm:$0xff] }
 0x1e3   :  { %v169_v24 = vadd.f32 %v166_v21, %v161_v22 }
 0x1e4   :  { %v229_v25 = vpop.eup %228 }
 0x1e5   :  { %v168_v27 = vmul.f32 0.6931472, %v229_v25  ;;  %v173_v28 = vsub.f32 %v171_v23, %v169_v24  ;;  %v177_v29 = vmul.f32 200.0, %v169_v24  ;;  %v176_v34 = vld [vmem:[#allocation4 + $0x8] sm:$0xff] }
 0x1e7   :  { %v170_v31 = vadd.f32 %v168_v27, %v162_v30  ;;  %v179_v32 = vsub.f32 %v175_v26, %v177_v29  ;;  %v187_v36 = vmul.f32 0.8995, %v173_v28 }
 0x1e9   :  { %v174_v35 = vsub.f32 %v172_v33, %v170_v31  ;;  %v189_v37 = vmul.f32 0.0005, %v179_v32  ;;  %v178_v38 = vmul.f32 200.0, %v170_v31 }
 0x1eb   :  { %v191_v39 = vadd.f32 %v189_v37, %v187_v36  ;;  %v180_v40 = vsub.f32 %v176_v34, %v178_v38  ;;  %v188_v41 = vmul.f32 0.8995, %v174_v35 }
 0x1ed   :  { %v193_v42 = vsub.f32 0.0, %v191_v39  ;;  %v190_v43 = vmul.f32 0.0005, %v180_v40 }
 0x1ef   :  { %v195_v44 = vmul.f32 %v325_v18, %v193_v42  ;;  %v192_v45 = vadd.f32 %v190_v43, %v188_v41 }
 0x1f1   :  { %197 = vst.msk [vmem:[%s365_s2] sm:$0xff] %vm29_vm0, %v195_v44  ;;  %v194_v46 = vsub.f32 0.0, %v192_v45 }
 0x1f3   :  { %v196_v47 = vmul.f32 %v323_v16, %v194_v46 }
 0x1f5   :  { %198 = vst.msk [vmem:[%s365_s2 + $0x8] sm:$0xff] %vm29_vm0, %v196_v47 }
 0x1f6   :  { %203 = vsyncpa [#allocation7], 1 }

</bundles_post_ra>
